<compile_context>
chip_gen: v5e
topology: v5e:2x2
jax: 0.10.0
libtpu: 0.0.40
codegen_flags: <defaults>
</compile_context>

<pallas_src>
import re

import jax
import jax.numpy as jnp
from jax.experimental import pallas as pl
from jax.experimental.pallas import tpu as pltpu


# ----------------------------------------------------------------------------
# Kernel
# ----------------------------------------------------------------------------
def _make_kernel(compute_dtype):
    """Kernel factory; `compute_dtype` is bf16 on v6e/v7x, f32 on v5e."""

    def kernel(h_ref, att_feats_ref, p_att_ref, mask_ref,
               w_h2att_ref, b_h2att_ref, w_alpha_ref, b_alpha_ref, out_ref):
        # --- h2att linear: bf16 x bf16 -> f32 acc on the MXU ------------------
        att_h = (jnp.dot(h_ref[...], w_h2att_ref[...],
                         preferred_element_type=jnp.float32)
                 + b_h2att_ref[...])                                 # (tB, H) f32

        # --- dot = tanh(p_att + att_h[:, None, :]) ----------------------------
        # Runs in the chip's fast VPU/EUP dtype (bf16 on v6e/v7x halves the
        # vreg/VMEM pressure of this largest intermediate; f32 on v5e).
        p = p_att_ref[...].astype(compute_dtype)                     # (tB, S, H)
        dot = jnp.tanh(p + att_h[:, None, :].astype(compute_dtype))

        # --- alpha_net: VPU mul + f32 lane-reduce over H (small H) ------------
        # TODO(synk): at att_hid >= 256 do this as an MXU (tB*S, H) @ (H, 1).
        w_alpha = w_alpha_ref[0, :].astype(compute_dtype)
        scores = jnp.sum((dot * w_alpha[None, None, :]).astype(jnp.float32),
                         axis=-1) + b_alpha_ref[0]                   # (tB, S) f32

        # --- softmax over S fused with the mask renorm ------------------------
        #   softmax(s)*m / sum(softmax(s)*m) == e*m / sum(e*m),  e = exp(s-max)
        # Exact divide (not approx reciprocal); clamp so an all-zero mask row
        # (e.g. padding of a ragged last batch block) yields 0, not NaN.
        mask = mask_ref[...].astype(jnp.float32)
        m = jnp.max(scores, axis=1, keepdims=True)
        e = jnp.exp(scores - m) * mask
        denom = jnp.maximum(jnp.sum(e, axis=1, keepdims=True), 1e-20)
        weight = e / denom                                           # (tB, S) f32

        # --- att_res = sum_S weight * att_feats  (VPU mul + sublane reduce) ---
        # att_feats stays in its residency dtype; the bf16->f32 promotion
        # happens in-register inside the fused multiply, no VMEM copy.
        att_res = jnp.sum(weight[:, :, None] * att_feats_ref[...], axis=1)
        out_ref[...] = att_res.astype(out_ref.dtype)

    return kernel


# ----------------------------------------------------------------------------
# Trace-time hardware query (best effort, safe fallbacks)
# ----------------------------------------------------------------------------
def _tpu_target():
    """Returns (generation:int, vmem_capacity_bytes:int)."""
    gen = 6
    try:
        kind = jax.devices()[0].device_kind.lower()   # e.g. "tpu v5 lite"
        match = re.search(r"v(\d+)", kind)
        if match:
            gen = int(match.group(1))
    except Exception:
        pass
    vmem_cap = 64 * 2**20 if gen >= 7 else 128 * 2**20
    try:
        vmem_cap = int(pltpu.get_tpu_info().vmem_capacity_bytes)
    except Exception:
        pass
    return gen, vmem_cap


# ----------------------------------------------------------------------------
# Wrapper
# ----------------------------------------------------------------------------
def cb_attention(h, att_feats, p_att_feats, params, att_masks=None):
    """JAX wrapper mirroring CB_Attention.forward."""
    B = att_feats.shape[0]
    D = att_feats.shape[-1]
    H = params["w_h2att"].shape[0]          # PyTorch weight: (att_hid, rnn)
    R = h.shape[-1]
    S = att_feats.size // B // D

    gen, vmem_cap = _tpu_target()

    # Large tensors are read in their caller-provided residency dtype: no
    # extra HBM cast pass here (store them in bf16 upstream to halve DMA).
    att_feats_ = att_feats.reshape(B, S, D)
    p_att_ = p_att_feats.reshape(B, S, H)
    if att_masks is None:
        mask = jnp.ones((B, S), jnp.bfloat16)           # 0/1: exact in bf16
    else:
        mask = att_masks.reshape(B, S)

    # h2att operands in bf16 (bf16-in / f32-acc is the fast MXU path on all
    # three generations); biases stay f32 for the accumulate.
    h_ = h.astype(jnp.bfloat16)
    w_h2att_t = params["w_h2att"].T.astype(jnp.bfloat16)             # (R, H)
    b_h2att = params["b_h2att"].reshape(1, H).astype(jnp.float32)
    w_alpha = params["w_alpha"].reshape(1, H).astype(jnp.float32)
    b_alpha = params["b_alpha"].reshape(1).astype(jnp.float32)       # SMEM scalar

    # v5e has no bf16 VALU/EUP -> keep the tanh path in f32 there; otherwise
    # bf16 (only when the residency dtype is already 16-bit, so we never
    # silently drop precision of f32-stored activations).
    compute_dtype = (jnp.bfloat16
                     if (gen >= 6 and p_att_.dtype.itemsize == 2)
                     else jnp.float32)
    cbytes = jnp.dtype(compute_dtype).itemsize

    # --- generation-aware VMEM budget --------------------------------------
    if vmem_cap >= 100 * 2**20:                 # v5e / v6e: 128 MiB physical
        budget, limit_cap = 72 * 2**20, 100 * 2**20
    else:                                       # v7x: 64 MiB physical
        budget, limit_cap = 26 * 2**20, 48 * 2**20

    # Per-batch-row VMEM bytes actually touched per grid step:
    #   double-buffered input tiles + tanh intermediate + f32 transients
    #   (alpha product, weighted product, score/exp/weight rows) + output.
    per_row = (2 * (S * H * p_att_.dtype.itemsize
                    + S * D * att_feats_.dtype.itemsize
                    + S * mask.dtype.itemsize
                    + R * 2 + D * 4)            # pipelined (2x-buffered) tiles
               + cbytes * S * H                 # tanh intermediate
               + 4 * S * H                      # f32 alpha-net product
               + 4 * S * D                      # f32 weighted product
               + 4 * 8 * S + 4 * (D + H))       # f32 score/exp/weight/att_h rows
    resident = R * H * 2 + 2 * H * 4 + 256      # weights + biases + slop

    if B <= 8:
        tB = B
    else:
        tB = int(max(8, min(((budget - resident) // max(per_row, 1)) // 8 * 8, B)))
        if gen >= 7 and B >= 16:
            # Keep >= 2 grid programs so the "parallel" batch axis feeds both
            # v7x TensorCores (no effect on single-TC v5e/v6e).
            tB = min(tB, max(8, (B // 2) // 8 * 8))
    grid = (pl.cdiv(B, tB),)

    step_bytes = tB * per_row + resident
    vmem_limit = int(min(max(2 * step_bytes, 32 * 2**20), limit_cap))

    kernel = _make_kernel(compute_dtype)
    out = pl.pallas_call(
        kernel,
        out_shape=jax.ShapeDtypeStruct((B, D), jnp.float32),
        grid=grid,
        in_specs=[
            pl.BlockSpec((tB, R), lambda b: (b, 0)),            # h
            pl.BlockSpec((tB, S, D), lambda b: (b, 0, 0)),      # att_feats
            pl.BlockSpec((tB, S, H), lambda b: (b, 0, 0)),      # p_att_feats
            pl.BlockSpec((tB, S), lambda b: (b, 0)),            # mask
            pl.BlockSpec((R, H), lambda b: (0, 0)),             # w_h2att (resident)
            pl.BlockSpec((1, H), lambda b: (0, 0)),             # b_h2att
            pl.BlockSpec((1, H), lambda b: (0, 0)),             # w_alpha
            pl.BlockSpec(memory_space=pltpu.MemorySpace.SMEM),  # b_alpha scalar
        ],
        out_specs=pl.BlockSpec((tB, D), lambda b: (b, 0)),
        compiler_params=pltpu.CompilerParams(
            dimension_semantics=("parallel",),
            vmem_limit_bytes=vmem_limit),
    )(h_, att_feats_, p_att_, mask, w_h2att_t, b_h2att, w_alpha, b_alpha)
    return out


# ----------------------------------------------------------------------------
# Pure-JAX reference of the PyTorch forward
# ----------------------------------------------------------------------------
def reference(h, att_feats, p_att_feats, params, att_masks=None):
    B = att_feats.shape[0]
    D = att_feats.shape[-1]
    H = params["w_h2att"].shape[0]
    S = att_feats.size // B // D
    att = p_att_feats.reshape(B, S, H).astype(jnp.float32)
    feats = att_feats.reshape(B, S, D).astype(jnp.float32)
    att_h = h.astype(jnp.float32) @ params["w_h2att"].T + params["b_h2att"]
    dot = jnp.tanh(att + att_h[:, None, :])
    scores = dot.reshape(-1, H) @ params["w_alpha"].reshape(H, 1) + params["b_alpha"]
    scores = scores.reshape(B, S)
    weight = jax.nn.softmax(scores, axis=1)
    if att_masks is not None:
        weight = weight * att_masks.reshape(B, S).astype(jnp.float32)
        weight = weight / weight.sum(1, keepdims=True)
    return jnp.einsum("bs,bsd->bd", weight, feats)


if __name__ == "__main__":
    # Small, module-consistent shapes.
    B = 2
    rnn_size = 32        # opt.rnn_size (== att feature dim)
    att_hid = 32         # opt.att_hid_size
    att_size = 16        # number of attention locations

    key = jax.random.PRNGKey(0)
    k = jax.random.split(key, 8)

    h = jax.random.normal(k[0], (B, rnn_size), jnp.float32)
    # The large precomputed tensors are stored once in bf16 by the caller
    # (residency dtype) so the kernel DMAs half the bytes with no per-call
    # cast pass in the wrapper.
    att_feats = jax.random.normal(
        k[1], (B, att_size, rnn_size), jnp.float32).astype(jnp.bfloat16)
    p_att_feats = jax.random.normal(
        k[2], (B, att_size, att_hid), jnp.float32).astype(jnp.bfloat16)
    att_masks = (jax.random.uniform(k[3], (B, att_size)) > 0.2).astype(jnp.float32)
    # Guarantee at least one unmasked position per row (same invariant the
    # PyTorch module relies on to avoid a 0/0 in the mask renorm).
    att_masks = att_masks.at[:, 0].set(1.0)

    params = {
        "w_h2att": 0.1 * jax.random.normal(k[4], (att_hid, rnn_size), jnp.float32),
        "b_h2att": 0.1 * jax.random.normal(k[5], (att_hid,), jnp.float32),
        "w_alpha": 0.1 * jax.random.normal(k[6], (1, att_hid), jnp.float32),
        "b_alpha": 0.1 * jax.random.normal(k[7], (1,), jnp.float32),
    }

    out = cb_attention(h, att_feats, p_att_feats, params, att_masks)
    out = jax.block_until_ready(out)

    ref = reference(h, att_feats, p_att_feats, params, att_masks)
    assert out.shape == (B, rnn_size)
    # Tolerance covers bf16 residency of the large tensors plus the bf16
    # MXU/tanh compute path on v6e/v7x (f32 path on v5e is tighter).
    err = jnp.max(jnp.abs(out - ref))
    assert jnp.allclose(out, ref, atol=3e-2, rtol=3e-2), f"max abs err {err}"

    print("KERNEL_OK")
</pallas_src>

<mosaic_0001>
module attributes {stable_mosaic.version = 11 : i64} {
  func.func @kernel(%arg0: i32, %arg1: memref<2x32xbf16, #tpu.memory_space<vmem>>, %arg2: memref<2x16x32xbf16, #tpu.memory_space<vmem>>, %arg3: memref<2x16x32xbf16, #tpu.memory_space<vmem>>, %arg4: memref<2x16xf32, #tpu.memory_space<vmem>>, %arg5: memref<32x32xbf16, #tpu.memory_space<vmem>>, %arg6: memref<1x32xf32, #tpu.memory_space<vmem>>, %arg7: memref<1x32xf32, #tpu.memory_space<vmem>>, %arg8: memref<1xf32, #tpu.memory_space<smem>>, %arg9: memref<2x32xf32, #tpu.memory_space<vmem>>) attributes {dimension_semantics = [#tpu.dimension_semantics<parallel>], iteration_bounds = array<i64: 1>, scalar_prefetch = 0 : i64, scratch_operands = 0 : i64, tpu.core_type = #tpu.core_type<tc>, window_params = [{transform_indices = @transform_0, window_bounds = array<i64: 2, 32>}, {transform_indices = @transform_1, window_bounds = array<i64: 2, 16, 32>}, {transform_indices = @transform_2, window_bounds = array<i64: 2, 16, 32>}, {transform_indices = @transform_3, window_bounds = array<i64: 2, 16>}, {pipeline_mode = #tpu.pipeline_mode<synchronous>, transform_indices = @transform_4, window_bounds = array<i64: 32, 32>}, {pipeline_mode = #tpu.pipeline_mode<synchronous>, transform_indices = @transform_5, window_bounds = array<i64: 1, 32>}, {pipeline_mode = #tpu.pipeline_mode<synchronous>, transform_indices = @transform_6, window_bounds = array<i64: 1, 32>}, {transform_indices = @transform_7, window_bounds = array<i64: 1>}, {transform_indices = @transform_8, window_bounds = array<i64: 2, 32>}]} {
    %c0 = arith.constant 0 : index
    %c0_0 = arith.constant 0 : index
    %0 = vector.load %arg1[%c0, %c0_0] : memref<2x32xbf16, #tpu.memory_space<vmem>>, vector<2x32xbf16>
    %c0_1 = arith.constant 0 : index
    %c0_2 = arith.constant 0 : index
    %1 = vector.load %arg5[%c0_1, %c0_2] : memref<32x32xbf16, #tpu.memory_space<vmem>>, vector<32x32xbf16>
    %cst = arith.constant dense<0.000000e+00> : vector<2x32xf32>
    %2 = tpu.matmul %0, %1, %cst {dimension_numbers = #tpu.dot_dimension_numbers<[1], [0], [0], [1], [0, 0, 1, 1], [], []>} : vector<2x32xbf16>, vector<32x32xbf16>, vector<2x32xf32> -> vector<2x32xf32>
    %c0_3 = arith.constant 0 : index
    %c0_4 = arith.constant 0 : index
    %3 = vector.load %arg6[%c0_3, %c0_4] : memref<1x32xf32, #tpu.memory_space<vmem>>, vector<1x32xf32>
    %4 = vector.broadcast %3 : vector<1x32xf32> to vector<2x32xf32>
    %5 = arith.addf %2, %4 : vector<2x32xf32>
    %c0_5 = arith.constant 0 : index
    %c0_6 = arith.constant 0 : index
    %c0_7 = arith.constant 0 : index
    %6 = vector.load %arg3[%c0_5, %c0_6, %c0_7] : memref<2x16x32xbf16, #tpu.memory_space<vmem>>, vector<2x16x32xbf16>
    %7 = vector.shape_cast %5 : vector<2x32xf32> to vector<2x1x32xf32>
    %8 = arith.truncf %7 : vector<2x1x32xf32> to vector<2x1x32xbf16>
    %9 = vector.broadcast %8 : vector<2x1x32xbf16> to vector<2x16x32xbf16>
    %10 = arith.addf %6, %9 : vector<2x16x32xbf16>
    %11 = math.tanh %10 : vector<2x16x32xbf16>
    %c0_8 = arith.constant 0 : index
    %c0_9 = arith.constant 0 : index
    %12 = vector.load %arg7[%c0_8, %c0_9] : memref<1x32xf32, #tpu.memory_space<vmem>>, vector<1x32xf32>
    %13 = vector.shape_cast %12 : vector<1x32xf32> to vector<32xf32>
    %14 = arith.truncf %13 : vector<32xf32> to vector<32xbf16>
    %15 = vector.shape_cast %14 : vector<32xbf16> to vector<1x1x32xbf16>
    %16 = vector.broadcast %15 : vector<1x1x32xbf16> to vector<2x16x32xbf16>
    %17 = arith.mulf %11, %16 : vector<2x16x32xbf16>
    %18 = arith.extf %17 : vector<2x16x32xbf16> to vector<2x16x32xf32>
    %cst_10 = arith.constant dense<0.000000e+00> : vector<2x16xf32>
    %19 = vector.multi_reduction <add>, %18, %cst_10 [2] : vector<2x16x32xf32> to vector<2x16xf32>
    %c0_11 = arith.constant 0 : index
    %20 = memref.load %arg8[%c0_11] : memref<1xf32, #tpu.memory_space<smem>>
    %21 = vector.broadcast %20 : f32 to vector<2x16xf32>
    %22 = arith.addf %19, %21 : vector<2x16xf32>
    %c0_12 = arith.constant 0 : index
    %c0_13 = arith.constant 0 : index
    %23 = vector.load %arg4[%c0_12, %c0_13] : memref<2x16xf32, #tpu.memory_space<vmem>>, vector<2x16xf32>
    %cst_14 = arith.constant dense<0xFF800000> : vector<2xf32>
    %24 = vector.multi_reduction <maximumf>, %22, %cst_14 [1] : vector<2x16xf32> to vector<2xf32>
    %25 = vector.shape_cast %24 : vector<2xf32> to vector<2x1xf32>
    %26 = vector.broadcast %25 : vector<2x1xf32> to vector<2x16xf32>
    %27 = arith.subf %22, %26 : vector<2x16xf32>
    %28 = math.exp %27 : vector<2x16xf32>
    %29 = arith.mulf %28, %23 : vector<2x16xf32>
    %cst_15 = arith.constant dense<0.000000e+00> : vector<2xf32>
    %30 = vector.multi_reduction <add>, %29, %cst_15 [1] : vector<2x16xf32> to vector<2xf32>
    %31 = vector.shape_cast %30 : vector<2xf32> to vector<2x1xf32>
    %cst_16 = arith.constant 9.99999968E-21 : f32
    %32 = vector.broadcast %cst_16 : f32 to vector<2x1xf32>
    %33 = arith.maximumf %31, %32 : vector<2x1xf32>
    %34 = vector.broadcast %33 : vector<2x1xf32> to vector<2x16xf32>
    %35 = arith.divf %29, %34 : vector<2x16xf32>
    %36 = vector.shape_cast %35 : vector<2x16xf32> to vector<2x16x1xf32>
    %c0_17 = arith.constant 0 : index
    %c0_18 = arith.constant 0 : index
    %c0_19 = arith.constant 0 : index
    %37 = vector.load %arg2[%c0_17, %c0_18, %c0_19] : memref<2x16x32xbf16, #tpu.memory_space<vmem>>, vector<2x16x32xbf16>
    %38 = arith.extf %37 : vector<2x16x32xbf16> to vector<2x16x32xf32>
    %39 = vector.broadcast %36 : vector<2x16x1xf32> to vector<2x16x32xf32>
    %40 = arith.mulf %39, %38 : vector<2x16x32xf32>
    %cst_20 = arith.constant dense<0.000000e+00> : vector<2x32xf32>
    %41 = vector.multi_reduction <add>, %40, %cst_20 [1] : vector<2x16x32xf32> to vector<2x32xf32>
    %c0_21 = arith.constant 0 : index
    %c0_22 = arith.constant 0 : index
    %42 = vector.load %arg9[%c0_21, %c0_22] : memref<2x32xf32, #tpu.memory_space<vmem>>, vector<2x32xf32>
    tpu.vector_store %arg9[%c0_21, %c0_22], %41 {strides = array<i32>} : memref<2x32xf32, #tpu.memory_space<vmem>>, vector<2x32xf32>,
    return
  }
  func.func @transform_0(%arg0: i32) -> (i32, i32) {
    %c0_i32 = arith.constant 0 : i32
    %c0_i32_0 = arith.constant 0 : i32
    return %arg0, %c0_i32 : i32, i32
  }
  func.func @transform_1(%arg0: i32) -> (i32, i32, i32) {
    %c0_i32 = arith.constant 0 : i32
    %c0_i32_0 = arith.constant 0 : i32
    %c0_i32_1 = arith.constant 0 : i32
    return %arg0, %c0_i32, %c0_i32_0 : i32, i32, i32
  }
  func.func @transform_2(%arg0: i32) -> (i32, i32, i32) {
    %c0_i32 = arith.constant 0 : i32
    %c0_i32_0 = arith.constant 0 : i32
    %c0_i32_1 = arith.constant 0 : i32
    return %arg0, %c0_i32, %c0_i32_0 : i32, i32, i32
  }
  func.func @transform_3(%arg0: i32) -> (i32, i32) {
    %c0_i32 = arith.constant 0 : i32
    %c0_i32_0 = arith.constant 0 : i32
    return %arg0, %c0_i32 : i32, i32
  }
  func.func @transform_4(%arg0: i32) -> (i32, i32) {
    %c0_i32 = arith.constant 0 : i32
    %c0_i32_0 = arith.constant 0 : i32
    %c0_i32_1 = arith.constant 0 : i32
    return %c0_i32, %c0_i32_0 : i32, i32
  }
  func.func @transform_5(%arg0: i32) -> (i32, i32) {
    %c0_i32 = arith.constant 0 : i32
    %c0_i32_0 = arith.constant 0 : i32
    %c0_i32_1 = arith.constant 0 : i32
    return %c0_i32, %c0_i32_0 : i32, i32
  }
  func.func @transform_6(%arg0: i32) -> (i32, i32) {
    %c0_i32 = arith.constant 0 : i32
    %c0_i32_0 = arith.constant 0 : i32
    %c0_i32_1 = arith.constant 0 : i32
    return %c0_i32, %c0_i32_0 : i32, i32
  }
  func.func @transform_7(%arg0: i32) -> i32 {
    %c0_i32 = arith.constant 0 : i32
    %c0_i32_0 = arith.constant 0 : i32
    return %c0_i32 : i32
  }
  func.func @transform_8(%arg0: i32) -> (i32, i32) {
    %c0_i32 = arith.constant 0 : i32
    %c0_i32_0 = arith.constant 0 : i32
    return %arg0, %c0_i32 : i32, i32
  }
}

</mosaic_0001>

<bundles_post_ra>
// kernel: tpu_custom_call.1
= control target key start
LH: loop header
LB: loop body
LE: loop exit
PB: predicated region body
PF: predicated region fallthrough
CT: control target
= control target key end

     0   :  { %14 = vsyncpa [#allocation4], 0  ;;  %s692_s0 = inlined_call_operand.vmem [shape: bf16[2,32], index: 0, kind: input, shape index: {}]   ;;  %s693_s1 = inlined_call_operand.hbm [shape: bf16[2,16,32], index: 1, kind: input, shape index: {}]   ;;  %s694_s2 = inlined_call_operand.hbm [shape: bf16[2,16,32], index: 2, kind: input, shape index: {}]   ;;  %s695_s3 = inlined_call_operand.vmem [shape: f32[2,16], index: 3, kind: input, shape index: {}]   ;;  %s696_s4 = inlined_call_operand.hbm [shape: bf16[32,32], index: 4, kind: input, shape index: {}]   ;;  %s697_s5 = inlined_call_operand.vmem [shape: f32[1,32], index: 5, kind: input, shape index: {}]   ;;  %s698_s6 = inlined_call_operand.vmem [shape: f32[1,32], index: 6, kind: input, shape index: {}]   ;;  %s699_s7 = inlined_call_operand.<no memory space> [shape: f32[1], index: 7, kind: input, shape index: {}]   ;;  %s700_s8 = inlined_call_operand.hbm [shape: f32[2,32], index: 8, kind: output, shape index: {}]  }
   0x1   :  { %15 = vsyncpa [#allocation7], 0 }
   0x2   :  { %16 = vsyncpa [#allocation5], 0  ;;  %s36_s29 = sshll.u32 %s694_s2, 4  ;;  %s578_s30 = smov [#allocation6]   ;;  %s37_s29 = int_to_ptr.hbm [resolvable:$true] %s36_s29 }
   0x3   :  { %s38_s9 = sshll.u32 %s578_s30, 4  ;;  %s23_s12 = sshll.u32 %s693_s1, 4  ;;  %s39_s9 = int_to_ptr.vmem [resolvable:$true] %s38_s9  ;;  %s24_s12 = int_to_ptr.hbm [resolvable:$true] %s23_s12 }
   0x4   :  { %s579_s13 = smov 64   ;;  %s580_s14 = smov 4  }
   0x5   :  { %44 = dma.hbm_to_vmem [thread:$0]  %s37_s29, 256, %s39_s9, [#allocation7], %s579_s13, %s579_s13, %s580_s14  }
   0x6   :  { %s581_s15 = smov [#allocation3]   ;;  %s51_s19 = sshll.u32 %s696_s4, 4  ;;  %s52_s19 = int_to_ptr.hbm [resolvable:$true] %s51_s19 }
   0x7   :  { %s25_s16 = sshll.u32 %s581_s15, 4  ;;  %s582_s2 = smov [#allocation8]   ;;  %s26_s16 = int_to_ptr.vmem [resolvable:$true] %s25_s16 }
   0x8   :  { %31 = dma.hbm_to_vmem [thread:$0]  %s24_s12, 256, %s26_s16, [#allocation4], %s579_s13, %s579_s13, %s580_s14  }
   0x9   :  { %s53_s20 = sshll.u32 %s582_s2, 4  ;;  %s54_s20 = int_to_ptr.vmem [resolvable:$true] %s53_s20 }
   0xa   :  { %59 = dma.hbm_to_vmem [thread:$0]  %s52_s19, 256, %s54_s20, [#allocation7], %s579_s13, %s579_s13, %s580_s14  }
   0xb   :  { %572 = dma.done.wait [#allocation4], 256  }
   0xc   :  { %573 = vsyncadd [#allocation4], 4294967040 }
   0xd   :  { %574 = dma.done.wait [#allocation7], 512  }
   0xe   :  { %575 = vsyncadd [#allocation7], 4294966784  ;;  %v422_v0 = vld [vmem:[#allocation8 + $0x8] sm:$0xff]  ;;  %v421_v1 = vld [vmem:[#allocation8] sm:$0xff]  ;;  %vm100_vm0 = vcmask 261120   ;;  %v204_v30 = vlaneseq  ;;  %vm209_vm1 = vcmask 130112  }
   0xf   :  { %110 = vmatpush.bf16.msra.mxu0 %v422_v0  ;;  %v79_v2 = vld [vmem:[%s692_s0] sm:$0x1]  ;;  %v424_v8 = vld [vmem:[#allocation6] sm:$0xff]   ;;  %v439_v11 = vld [vmem:[#allocation6 + $0x8] sm:$0xff]   ;;  %vm214_vm2 = vcmask 1041409   ;;  %vm217_vm3 = vcmask 123904  }
  0x10   :  { %v455_v3 = vld [vmem:[%s697_s5] ss:$0 sm:$0xff]  ;;  %v425_v12 = vunpack.c.l.bf16 %v424_v8  ;;  %v426_v13 = vunpack.c.h.bf16 %v424_v8  ;;  %v429_v17 = vunpack.c.l.bf16 %v439_v11  ;;  %v430_v18 = vunpack.c.h.bf16 %v439_v11  ;;  %s401_s28 = sshll.u32 %s700_s8, 4  ;;  %s402_s28 = int_to_ptr.hbm [resolvable:$true] %s401_s28 }
  0x11   :  { %v160_v21 = vld [vmem:[%s698_s6] sm:$0x1]  ;;  %v241_v36 = vshrl.u32 %v204_v30, 7  ;;  %vm392_vm12 = vcmask 254976  }
  0x12   :  { %v161_v25 = vpack.c.bf16 %v160_v21, %v160_v21  ;;  %v652_v39 = vld [vmem:[%s695_s3] sm:$0x3] }
  0x13   :  { %111 = vmatpush.bf16.msra.mxu0 %v421_v1  ;;  %448 = vset.pattern.permute.xlu2 %v241_v36  ;;  %v239_v41 = vperm.slane %v652_v39, 0 }
  0x14   :  { %v163_v35 = vpack.i.b16 %v161_v25, %v161_v25  ;;  %450 = vset.pattern.permute.xlu1 %v241_v36 }
  0x16   :  { %420 = vmatmul.msk.bf16.vlgmr.msra.gmra.mxu0 %vm100_vm0, %v79_v2  ;;  %v165_v40 = vperm.slane %v163_v35, 0 }
  0x18   :  { %v170_v45 = vunpack.c.l.bf16 %v165_v40 }
  0x1b   :  { %244 = vperm.xlu2 %448, %v239_v41  }
  0x93   :  { %v113_v4 = vpop.f32.mrf.mxu0 }
  0x94   :  { %v114_v5 = vadd.f32 %v455_v3, %v113_v4 }
  0x96   :  { %v122_v6 = vrot.slane %v114_v5, 1  ;;  %v124_v7 = vpack.c.bf16 %v114_v5, %v114_v5  ;;  %v252_v5 = vperm.slane %v652_v39, 1 }
  0x98   :  { %v125_v9 = vpack.c.bf16 %v122_v6, %v122_v6  ;;  %v127_v10 = vpack.i.b16 %v124_v7, %v124_v7  ;;  %v248_v6 = vadd.s32 8, %v241_v36 }
  0x9a   :  { %v129_v14 = vperm.slane %v127_v10, 0  ;;  %v131_v15 = vpack.i.b16 %v125_v9, %v125_v9  ;;  %449 = vset.pattern.permute.xlu0 %v248_v6  ;;  %451 = vset.pattern.permute.xlu2 %v248_v6  ;;  %v660_v9 = vand.u32 127, %v204_v30  ;;  %v194_v10 = vstv %s699_s7  ;;  %s584_s7 = smov [#allocation9]  }
  0x9b   :  { %v115_v16 = vpop.f32.mrf.mxu0  ;;  %s399_s25 = sshll.u32 %s584_s7, 4  ;;  %s400_s25 = int_to_ptr.vmem [resolvable:$true] %s399_s25 }
  0x9c   :  { %v133_v19 = vperm.slane %v131_v15, 0  ;;  %v138_v20 = vunpack.c.l.bf16 %v129_v14  ;;  %v666_v11 = vadd.s32 4294967288, %v660_v9 }
  0x9e   :  { %v139_v22 = vunpack.c.l.bf16 %v133_v19  ;;  %v140_v23 = vadd.f32 %v425_v12, %v138_v20  ;;  %v141_v24 = vadd.f32 %v426_v13, %v138_v20 }
  0xa0   :  { %v142_v26 = vadd.f32 %v429_v17, %v139_v22  ;;  %v143_v27 = vadd.f32 %v430_v18, %v139_v22  ;;  %v144_v28 = vpack.c.bf16 %v140_v23, %v140_v23  ;;  %v145_v29 = vpack.c.bf16 %v141_v24, %v141_v24 }
  0xa2   :  { %v146_v31 = vpack.c.bf16 %v142_v26, %v142_v26  ;;  %v147_v32 = vpack.c.bf16 %v143_v27, %v143_v27  ;;  %v148_v33 = vunpack.c.l.bf16 %v144_v28  ;;  %v149_v34 = vunpack.c.l.bf16 %v145_v29  ;;  %v245_v27 = vpop.permute.xlu2 %244 }
  0xa3   :  { %v583_v26 = vmov 0  }
  0xa4   :  { %v150_v37 = vunpack.c.l.bf16 %v146_v31  ;;  %v151_v38 = vunpack.c.l.bf16 %v147_v32  ;;  %456 = vtanh.f32 %v148_v33 }
  0xa5   :  { %458 = vtanh.f32 %v149_v34 }
  0xa6   :  { %460 = vtanh.f32 %v150_v37 }
  0xa7   :  { %462 = vtanh.f32 %v151_v38 }
  0xaa   :  { %v457_v42 = vpop.eup %456 }
  0xab   :  { %v459_v43 = vpop.eup %458  ;;  %v156_v44 = vpack.c.bf16 %v457_v42, %v457_v42 }
  0xac   :  { %v461_v46 = vpop.eup %460  ;;  %v157_v47 = vpack.c.bf16 %v459_v43, %v459_v43 }
  0xad   :  { %v463_v48 = vpop.eup %462  ;;  %v166_v49 = vunpack.c.l.bf16 %v156_v44  ;;  %v158_v50 = vpack.c.bf16 %v461_v46, %v461_v46 }
  0xae   :  { %v167_v51 = vunpack.c.l.bf16 %v157_v47  ;;  %v159_v52 = vpack.c.bf16 %v463_v48, %v463_v48 }
  0xaf   :  { %v171_v53 = vmul.f32 %v170_v45, %v166_v49  ;;  %v168_v54 = vunpack.c.l.bf16 %v158_v50 }
  0xb0   :  { %v172_v55 = vmul.f32 %v170_v45, %v167_v51  ;;  %v169_v56 = vunpack.c.l.bf16 %v159_v52 }
  0xb1   :  { %v173_v57 = vmul.f32 %v170_v45, %v168_v54 }
  0xb2   :  { %v175_v58 = vpack.c.bf16 %v172_v55, %v171_v53  ;;  %v174_v59 = vmul.f32 %v170_v45, %v169_v56 }
  0xb4   :  { %v177_v60 = vunpack.c.l.bf16 %v175_v58  ;;  %v176_v61 = vpack.c.bf16 %v174_v59, %v173_v57  ;;  %v178_v1 = vunpack.c.h.bf16 %v175_v58 }
  0xb6   :  { %v181_v62 = vsel %vm100_vm0, %v177_v60, 0.0  ;;  %v179_v63 = vunpack.c.l.bf16 %v176_v61  ;;  %v180_v2 = vunpack.c.h.bf16 %v176_v61  ;;  %v184_v3 = vsel %vm100_vm0, %v178_v1, 0.0 }
  0xb7   :  { %182 = vadd.xlane.f32.xlu0 %v181_v62 }
  0xb8   :  { %v187_v0 = vsel %vm100_vm0, %v179_v63, 0.0  ;;  %v190_v4 = vsel %vm100_vm0, %v180_v2, 0.0 }
  0xb9   :  { %188 = vadd.xlane.f32.xlu1 %v187_v0 }
  0xbf   :  { %185 = vadd.xlane.f32.xlu0 %v184_v3 }
  0xc1   :  { %191 = vadd.xlane.f32.xlu1 %v190_v4 }
  0xd3   :  { %250 = vperm.xlu0 %449, %v239_v41  }
  0xda   :  { %257 = vperm.xlu1 %450, %v252_v5  }
  0xdb   :  { %454 = vset.pattern.permute.xlu0 %v583_v26 }
  0xe2   :  { %453 = vset.pattern.permute.xlu1 %v583_v26 }
 0x12a   :  { %v183_v7 = vpop.xlane.xlu0 %182 }
 0x12b   :  { %v195_v13 = vadd.f32 %v194_v10, %v183_v7 }
 0x12c   :  { %v189_v8 = vpop.xlane.xlu1 %188 }
 0x12d   :  { %v197_v14 = vadd.f32 %v194_v10, %v189_v8  ;;  %v206_v19 = vperm.slane %v195_v13, %v660_v9 }
 0x12f   :  { %v211_v20 = vperm.slane %v197_v14, %v660_v9 }
 0x132   :  { %v186_v12 = vpop.xlane.xlu0 %185 }
 0x133   :  { %v196_v15 = vadd.f32 %v194_v10, %v186_v12 }
 0x134   :  { %v192_v16 = vpop.xlane.xlu1 %191 }
 0x135   :  { %v208_v17 = vperm.slane %v196_v15, %v666_v11  ;;  %v198_v18 = vadd.f32 %v194_v10, %v192_v16 }
 0x137   :  { %v212_v21 = vperm.slane %v198_v18, %v666_v11  ;;  %v210_v22 = vsel %vm209_vm1, %v208_v17, %v206_v19 }
 0x139   :  { %v213_v23 = vsel %vm209_vm1, %v212_v21, %v211_v20 }
 0x13a   :  { %v215_v24 = vsel %vm214_vm2, %v213_v23, %v210_v22 }
 0x13b   :  { %v218_v25 = vsel %vm217_vm3, %v215_v24, -inf }
 0x13c   :  { %219 = vmax.xlane.f32.xlu2 %v218_v25 }
 0x145   :  { %v251_v39 = vpop.permute.xlu0 %250 }
 0x14c   :  { %v258_v45 = vpop.permute.xlu1 %257 }
 0x154   :  { %263 = vperm.xlu2 %451, %v252_v5  }
 0x15c   :  { %452 = vset.pattern.permute.xlu2 %v583_v26  ;;  %v432_v26 = vld [vmem:[#allocation3] sm:$0xff]  }
 0x1af   :  { %v220_v28 = vpop.xlane.xlu2 %219 }
 0x1b0   :  { %v222_v29 = vperm.slane %v220_v28, 0  ;;  %v223_v30 = vperm.slane %v220_v28, 1  ;;  %v433_v28 = vunpack.c.l.bf16 %v432_v26 }
 0x1b2   :  { %v226_v31 = vsub.f32 %v195_v13, %v222_v29  ;;  %v227_v32 = vsub.f32 %v196_v15, %v222_v29  ;;  %v228_v33 = vsub.f32 %v197_v14, %v223_v30  ;;  %v229_v36 = vsub.f32 %v198_v18, %v223_v30 }
 0x1b3   :  { %v434_v29 = vunpack.c.h.bf16 %v432_v26 }
 0x1b4   :  { %v230_v34 = vmul.f32 1.442695, %v226_v31  ;;  %v232_v35 = vmul.f32 1.442695, %v227_v32  ;;  %v234_v37 = vmul.f32 1.442695, %v228_v33 }
 0x1b5   :  { %v236_v38 = vmul.f32 1.442695, %v229_v36  ;;  %v440_v31 = vld [vmem:[#allocation3 + $0x8] sm:$0xff]  }
 0x1b6   :  { %464 = vpow2.f32 %v230_v34 }
 0x1b7   :  { %466 = vpow2.f32 %v232_v35  ;;  %v264_v47 = vpop.permute.xlu2 %263  ;;  %v437_v35 = vunpack.c.l.bf16 %v440_v31 }
 0x1b8   :  { %468 = vpow2.f32 %v234_v37 }
 0x1b9   :  { %470 = vpow2.f32 %v236_v38 }
 0x1bc   :  { %v465_v40 = vpop.eup %464 }
 0x1bd   :  { %v467_v41 = vpop.eup %466  ;;  %v269_v42 = vmul.f32 %v465_v40, %v245_v27 }
 0x1be   :  { %v270_v43 = vmul.f32 %v467_v41, %v251_v39  ;;  %v469_v44 = vpop.eup %468  ;;  %v438_v39 = vunpack.c.h.bf16 %v440_v31 }
 0x1bf   :  { %278 = vperm.xlu2 %452, %v269_v42   ;;  %v471_v46 = vpop.eup %470  ;;  %v271_v48 = vmul.f32 %v469_v44, %v258_v45 }
 0x1c0   :  { %281 = vperm.xlu1 %453, %v270_v43   ;;  %v272_v49 = vmul.f32 %v471_v46, %v264_v47 }
 0x1c7   :  { %284 = vperm.xlu2 %452, %v271_v48  }
 0x1c8   :  { %287 = vperm.xlu1 %453, %v272_v49  }
 0x219   :  { %v279_v50 = vpop.permute.xlu2 %278 }
 0x21a   :  { %v289_v55 = vperm.slane %v279_v50, %v660_v9 }
 0x221   :  { %v285_v52 = vpop.permute.xlu2 %284 }
 0x222   :  { %v292_v56 = vperm.slane %v285_v52, %v660_v9 }
 0x232   :  { %v282_v51 = vpop.permute.xlu1 %281 }
 0x233   :  { %v290_v53 = vperm.slane %v282_v51, %v666_v11 }
 0x235   :  { %v291_v58 = vsel %vm209_vm1, %v290_v53, %v289_v55 }
 0x23a   :  { %v288_v54 = vpop.permute.xlu1 %287 }
 0x23b   :  { %v293_v57 = vperm.slane %v288_v54, %v666_v11 }
 0x23d   :  { %v294_v59 = vsel %vm209_vm1, %v293_v57, %v292_v56 }
 0x23e   :  { %v295_v60 = vsel %vm214_vm2, %v294_v59, %v291_v58 }
 0x23f   :  { %v297_v61 = vsel %vm217_vm3, %v295_v60, 0.0 }
 0x240   :  { %298 = vadd.xlane.f32.xlu0 %v297_v61 }
 0x2b3   :  { %v299_v62 = vpop.xlane.xlu0 %298 }
 0x2b4   :  { %v300_v63 = vmax.f32 %v299_v62, 1e-20 }
 0x2b6   :  { %v302_v0 = vperm.slane %v300_v63, 0  ;;  %v303_v1 = vperm.slane %v300_v63, 1 }
 0x2b8   :  { %472 = vrcp.f32 %v302_v0  ;;  %v317_v8 = vand.u32 2147483648, %v302_v0  ;;  %v315_v10 = vand.u32 2147483647, %v302_v0  ;;  %vm311_vm5 = vweird.f32 %v302_v0 }
 0x2b9   :  { %474 = vrcp.f32 %v303_v1  ;;  %v333_v17 = vand.u32 2147483648, %v303_v1  ;;  %vm327_vm9 = vweird.f32 %v303_v1  ;;  %v331_v20 = vand.u32 2147483647, %v303_v1 }
 0x2ba   :  { %v318_v13 = vor.u32 1.1754944e-38, %v317_v8  ;;  %vm316_vm7 = vcmp.eq.f32.partialorder %v315_v10, 8.507059e+37 }
 0x2bb   :  { %v334_v22 = vor.u32 1.1754944e-38, %v333_v17  ;;  %vm332_vm11 = vcmp.eq.f32.partialorder %v331_v20, 8.507059e+37 }
 0x2be   :  { %v473_v2 = vpop.eup %472 }
 0x2bf   :  { %v475_v3 = vpop.eup %474  ;;  %v307_v4 = vmul.f32 %v473_v2, %v302_v0  ;;  %vm312_vm4 = vweird.f32 %v473_v2 }
 0x2c0   :  { %v323_v5 = vmul.f32 %v475_v3, %v303_v1  ;;  %vm313_vm6 = vmor %vm311_vm5, %vm312_vm4  ;;  %vm328_vm8 = vweird.f32 %v475_v3 }
 0x2c1   :  { %v308_v6 = vsub.f32 1.0, %v307_v4  ;;  %vm329_vm10 = vmor %vm327_vm9, %vm328_vm8 }
 0x2c2   :  { %v324_v7 = vsub.f32 1.0, %v323_v5 }
 0x2c3   :  { %v309_v9 = vmul.f32 %v473_v2, %v308_v6 }
 0x2c4   :  { %v325_v11 = vmul.f32 %v475_v3, %v324_v7 }
 0x2c5   :  { %v310_v12 = vadd.f32 %v473_v2, %v309_v9 }
 0x2c6   :  { %v326_v15 = vadd.f32 %v475_v3, %v325_v11 }
 0x2c7   :  { %v314_v14 = vsel %vm313_vm6, %v473_v2, %v310_v12 }
 0x2c8   :  { %v319_v16 = vsel %vm316_vm7, %v318_v13, %v314_v14  ;;  %v330_v21 = vsel %vm329_vm10, %v475_v3, %v326_v15 }
 0x2c9   :  { %v321_v18 = vmul.f32 %v319_v16, %v270_v43  ;;  %v320_v19 = vmul.f32 %v319_v16, %v269_v42  ;;  %v335_v23 = vsel %vm332_vm11, %v334_v22, %v330_v21 }
 0x2ca   :  { %v337_v24 = vmul.f32 %v335_v23, %v272_v49  ;;  %v336_v25 = vmul.f32 %v335_v23, %v271_v48 }
 0x2cb   :  { %353 = vperm.xlu1 %453, %v321_v18   ;;  %348 = vperm.xlu2 %452, %v320_v19  }
 0x2d3   :  { %363 = vperm.xlu1 %453, %v337_v24   ;;  %358 = vperm.xlu2 %452, %v336_v25  }
 0x325   :  { %v349_v27 = vpop.permute.xlu2 %348 }
 0x326   :  { %v366_v30 = vmul.f32 %v433_v28, %v349_v27 }
 0x328   :  { %v370_v34 = vsel %vm100_vm0, %v366_v30, 0.0 }
 0x32d   :  { %v359_v37 = vpop.permute.xlu2 %358 }
 0x32e   :  { %v368_v41 = vmul.f32 %v437_v35, %v359_v37 }
 0x330   :  { %v379_v45 = vsel %vm100_vm0, %v368_v41, 0.0 }
 0x33d   :  { %v354_v32 = vpop.permute.xlu1 %353 }
 0x33e   :  { %v367_v33 = vmul.f32 %v434_v29, %v354_v32 }
 0x340   :  { %v371_v36 = vsel %vm100_vm0, %v367_v33, 0.0 }
 0x341   :  { %v372_v38 = vadd.f32 %v371_v36, %v370_v34 }
 0x343   :  { %v373_v40 = vrot.slane %v372_v38, 4 }
 0x345   :  { %v374_v42 = vadd.f32 %v373_v40, %v372_v38  ;;  %v364_v43 = vpop.permute.xlu1 %363 }
 0x346   :  { %v369_v44 = vmul.f32 %v438_v39, %v364_v43 }
 0x347   :  { %v375_v47 = vrot.slane %v374_v42, 2 }
 0x348   :  { %v380_v46 = vsel %vm100_vm0, %v369_v44, 0.0 }
 0x349   :  { %v381_v48 = vadd.f32 %v380_v46, %v379_v45  ;;  %v376_v50 = vadd.f32 %v375_v47, %v374_v42 }
 0x34b   :  { %v382_v49 = vrot.slane %v381_v48, 4  ;;  %v377_v53 = vrot.slane %v376_v50, 1 }
 0x34d   :  { %v383_v51 = vadd.f32 %v382_v49, %v381_v48  ;;  %v378_v56 = vadd.f32 %v377_v53, %v376_v50 }
 0x34f   :  { %v384_v52 = vrot.slane %v383_v51, 2 }
 0x351   :  { %v385_v54 = vadd.f32 %v384_v52, %v383_v51 }
 0x353   :  { %v386_v55 = vrot.slane %v385_v54, 1 }
 0x355   :  { %v387_v57 = vadd.f32 %v386_v55, %v385_v54 }
 0x357   :  { %v390_v58 = vsel %vm214_vm2, %v387_v57, %v378_v56 }
 0x358   :  { %393 = vst.msk [vmem:[#allocation9] sm:$0x3] %vm392_vm12, %v390_v58 }
 0x359   :  { %404 = dma.vmem_to_hbm [thread:$0]  %s400_s25, 32, %s402_s28, [#allocation5]  }
 0x35a   :  { %576 = dma.done.wait [#allocation5], 32  }
 0x35b   :  { %577 = vsyncadd [#allocation5], 4294967264 }
 0x35c   :  { %409 = vsyncpa [#allocation4], 1 }
 0x35d   :  { %410 = vsyncpa [#allocation7], 1 }
 0x35e   :  { %411 = vsyncpa [#allocation5], 1 }

</bundles_post_ra>
